<compile_context>
chip_gen: v7x
topology: tpu7x:2x2x1
jax: 0.10.0
libtpu: 0.0.40
codegen_flags: <defaults>
</compile_context>

<pallas_src>
import jax
import jax.numpy as jnp
from jax.experimental import pallas as pl
from jax.experimental.pallas import tpu as pltpu

INPUT_DIM = 32          # Encoder input_dim (small synthetic choice)
LATENT_DIM = 10         # Encoder latent_dim
HIDDEN = [120, 110, 100, 90, 80, 70]
BATCH = 16
LANE = 128              # all feature dims padded to one full lane width
N_LAYERS = 7


def encoder_kernel(x_ref, w_ref, b_ref, out_ref):
    """All 7 layers fused; single invocation (no grid), fully VMEM-resident.

    x_ref   : (B, 128)       lane-padded input (real features in lanes [0,32))
    w_ref   : (7*128, 128)   concatenated zero-padded weights, (in, out) layout
    b_ref   : (8, 128)       rows 0..6 = per-layer biases, row 7 = zero pad
    out_ref : (B, 128)       lane-padded latent (real latent in lanes [0,10))
    """
    h = x_ref[...]
    for li in range(N_LAYERS):                       # static unrolled loop
        w = w_ref[pl.ds(li * LANE, LANE), :]         # free static slice
        b = b_ref[li:li + 1, :]                      # (1,128), free static slice
        z = jnp.dot(h, w, preferred_element_type=jnp.float32) + b
        if li < N_LAYERS - 1:
            h = jnp.maximum(z, 0.2 * z)              # LeakyReLU(0.2)
        else:
            h = jnp.tanh(z)
    out_ref[...] = h.astype(out_ref.dtype)


def init_params(key, input_dim=INPUT_DIM, latent_dim=LATENT_DIM):
    """PyTorch-style uniform(+-1/sqrt(fan_in)) init.

    Returns UNPADDED weights transposed to (in, out) and biases as (out,).
    """
    dims = [input_dim] + HIDDEN + [latent_dim]
    params = []
    for i in range(len(dims) - 1):
        fan_in, fan_out = dims[i], dims[i + 1]
        key, kw, kb = jax.random.split(key, 3)
        bound = 1.0 / (fan_in ** 0.5)
        w = jax.random.uniform(kw, (fan_in, fan_out), jnp.float32,
                               minval=-bound, maxval=bound)
        b = jax.random.uniform(kb, (fan_out,), jnp.float32,
                               minval=-bound, maxval=bound)
        params.append((w, b))
    return params


def pack_params(params):
    """Pack all layers into one weight slab and one bias tile (zero padded)."""
    w_all = jnp.zeros((N_LAYERS * LANE, LANE), jnp.float32)
    b_all = jnp.zeros((8, LANE), jnp.float32)        # 7 real rows + 1 pad row
    for li, (w, b) in enumerate(params):
        fi, fo = w.shape
        w_all = w_all.at[li * LANE:li * LANE + fi, :fo].set(w)
        b_all = b_all.at[li, :fo].set(b)
    # bf16 option (v6e/v7x, larger batches): return w_all.astype(jnp.bfloat16)
    return w_all, b_all


@jax.jit
def encoder_forward(x, w_all, b_all):
    B, in_dim = x.shape
    # Lane-pad the input so every layer is a uniform (B,128)x(128,128) matmul.
    x_pad = jnp.zeros((B, LANE), jnp.float32).at[:, :in_dim].set(x)

    vmem_spec = pl.BlockSpec(memory_space=pltpu.MemorySpace.VMEM)
    out_padded = pl.pallas_call(
        encoder_kernel,
        out_shape=jax.ShapeDtypeStruct((B, LANE), jnp.float32),
        in_specs=[vmem_spec, vmem_spec, vmem_spec],
        out_specs=vmem_spec,
    )(x_pad, w_all, b_all)

    # Slice the real latent out of the lane-dense (B, 128) output.
    return out_padded[:, :LATENT_DIM]


def encoder_reference(x, params):
    """Pure-JAX reference matching the PyTorch forward (unpadded params)."""
    h = x
    n = len(params)
    for i, (w, b) in enumerate(params):
        h = h @ w + b
        if i < n - 1:
            h = jnp.where(h > 0, h, 0.2 * h)
        else:
            h = jnp.tanh(h)
    return h


if __name__ == "__main__":
    key = jax.random.PRNGKey(0)
    k_x, k_p = jax.random.split(key)

    x = jax.random.normal(k_x, (BATCH, INPUT_DIM), dtype=jnp.float32)
    params = init_params(k_p)
    w_all, b_all = pack_params(params)

    out = encoder_forward(x, w_all, b_all)
    out = jax.block_until_ready(out)

    ref = encoder_reference(x, params)
    assert out.shape == (BATCH, LATENT_DIM)
    assert jnp.allclose(out, ref, atol=1e-5, rtol=1e-5), "mismatch vs reference"

    print("KERNEL_OK")
</pallas_src>

<mosaic_0001>
module attributes {stable_mosaic.version = 11 : i64} {
  func.func @encoder_kernel(%arg0: memref<16x128xf32, #tpu.memory_space<vmem>>, %arg1: memref<896x128xf32, #tpu.memory_space<vmem>>, %arg2: memref<8x128xf32, #tpu.memory_space<vmem>>, %arg3: memref<16x128xf32, #tpu.memory_space<vmem>>) attributes {dimension_semantics = [], scalar_prefetch = 0 : i64, scratch_operands = 0 : i64, tpu.core_type = #tpu.core_type<tc>} {
    %c0 = arith.constant 0 : index
    %c0_0 = arith.constant 0 : index
    %0 = vector.load %arg0[%c0, %c0_0] : memref<16x128xf32, #tpu.memory_space<vmem>>, vector<16x128xf32>
    %c0_1 = arith.constant 0 : index
    %c0_2 = arith.constant 0 : index
    %1 = vector.load %arg1[%c0_1, %c0_2] : memref<896x128xf32, #tpu.memory_space<vmem>>, vector<128x128xf32>
    %c0_3 = arith.constant 0 : index
    %c0_4 = arith.constant 0 : index
    %2 = vector.load %arg2[%c0_3, %c0_4] : memref<8x128xf32, #tpu.memory_space<vmem>>, vector<1x128xf32>
    %cst = arith.constant dense<0.000000e+00> : vector<16x128xf32>
    %3 = tpu.matmul %0, %1, %cst {dimension_numbers = #tpu.dot_dimension_numbers<[1], [0], [0], [1], [0, 0, 1, 1], [], []>} : vector<16x128xf32>, vector<128x128xf32>, vector<16x128xf32> -> vector<16x128xf32>
    %4 = vector.broadcast %2 : vector<1x128xf32> to vector<16x128xf32>
    %5 = arith.addf %3, %4 : vector<16x128xf32>
    %cst_5 = arith.constant 2.000000e-01 : f32
    %6 = vector.broadcast %cst_5 : f32 to vector<16x128xf32>
    %7 = arith.mulf %6, %5 : vector<16x128xf32>
    %8 = arith.maximumf %5, %7 : vector<16x128xf32>
    %c128 = arith.constant 128 : index
    %c0_6 = arith.constant 0 : index
    %9 = vector.load %arg1[%c128, %c0_6] : memref<896x128xf32, #tpu.memory_space<vmem>>, vector<128x128xf32>
    %c1 = arith.constant 1 : index
    %c0_7 = arith.constant 0 : index
    %10 = vector.load %arg2[%c1, %c0_7] : memref<8x128xf32, #tpu.memory_space<vmem>>, vector<1x128xf32>
    %cst_8 = arith.constant dense<0.000000e+00> : vector<16x128xf32>
    %11 = tpu.matmul %8, %9, %cst_8 {dimension_numbers = #tpu.dot_dimension_numbers<[1], [0], [0], [1], [0, 0, 1, 1], [], []>} : vector<16x128xf32>, vector<128x128xf32>, vector<16x128xf32> -> vector<16x128xf32>
    %12 = vector.broadcast %10 : vector<1x128xf32> to vector<16x128xf32>
    %13 = arith.addf %11, %12 : vector<16x128xf32>
    %cst_9 = arith.constant 2.000000e-01 : f32
    %14 = vector.broadcast %cst_9 : f32 to vector<16x128xf32>
    %15 = arith.mulf %14, %13 : vector<16x128xf32>
    %16 = arith.maximumf %13, %15 : vector<16x128xf32>
    %c256 = arith.constant 256 : index
    %c0_10 = arith.constant 0 : index
    %17 = vector.load %arg1[%c256, %c0_10] : memref<896x128xf32, #tpu.memory_space<vmem>>, vector<128x128xf32>
    %c2 = arith.constant 2 : index
    %c0_11 = arith.constant 0 : index
    %18 = vector.load %arg2[%c2, %c0_11] : memref<8x128xf32, #tpu.memory_space<vmem>>, vector<1x128xf32>
    %cst_12 = arith.constant dense<0.000000e+00> : vector<16x128xf32>
    %19 = tpu.matmul %16, %17, %cst_12 {dimension_numbers = #tpu.dot_dimension_numbers<[1], [0], [0], [1], [0, 0, 1, 1], [], []>} : vector<16x128xf32>, vector<128x128xf32>, vector<16x128xf32> -> vector<16x128xf32>
    %20 = vector.broadcast %18 : vector<1x128xf32> to vector<16x128xf32>
    %21 = arith.addf %19, %20 : vector<16x128xf32>
    %cst_13 = arith.constant 2.000000e-01 : f32
    %22 = vector.broadcast %cst_13 : f32 to vector<16x128xf32>
    %23 = arith.mulf %22, %21 : vector<16x128xf32>
    %24 = arith.maximumf %21, %23 : vector<16x128xf32>
    %c384 = arith.constant 384 : index
    %c0_14 = arith.constant 0 : index
    %25 = vector.load %arg1[%c384, %c0_14] : memref<896x128xf32, #tpu.memory_space<vmem>>, vector<128x128xf32>
    %c3 = arith.constant 3 : index
    %c0_15 = arith.constant 0 : index
    %26 = vector.load %arg2[%c3, %c0_15] : memref<8x128xf32, #tpu.memory_space<vmem>>, vector<1x128xf32>
    %cst_16 = arith.constant dense<0.000000e+00> : vector<16x128xf32>
    %27 = tpu.matmul %24, %25, %cst_16 {dimension_numbers = #tpu.dot_dimension_numbers<[1], [0], [0], [1], [0, 0, 1, 1], [], []>} : vector<16x128xf32>, vector<128x128xf32>, vector<16x128xf32> -> vector<16x128xf32>
    %28 = vector.broadcast %26 : vector<1x128xf32> to vector<16x128xf32>
    %29 = arith.addf %27, %28 : vector<16x128xf32>
    %cst_17 = arith.constant 2.000000e-01 : f32
    %30 = vector.broadcast %cst_17 : f32 to vector<16x128xf32>
    %31 = arith.mulf %30, %29 : vector<16x128xf32>
    %32 = arith.maximumf %29, %31 : vector<16x128xf32>
    %c512 = arith.constant 512 : index
    %c0_18 = arith.constant 0 : index
    %33 = vector.load %arg1[%c512, %c0_18] : memref<896x128xf32, #tpu.memory_space<vmem>>, vector<128x128xf32>
    %c4 = arith.constant 4 : index
    %c0_19 = arith.constant 0 : index
    %34 = vector.load %arg2[%c4, %c0_19] : memref<8x128xf32, #tpu.memory_space<vmem>>, vector<1x128xf32>
    %cst_20 = arith.constant dense<0.000000e+00> : vector<16x128xf32>
    %35 = tpu.matmul %32, %33, %cst_20 {dimension_numbers = #tpu.dot_dimension_numbers<[1], [0], [0], [1], [0, 0, 1, 1], [], []>} : vector<16x128xf32>, vector<128x128xf32>, vector<16x128xf32> -> vector<16x128xf32>
    %36 = vector.broadcast %34 : vector<1x128xf32> to vector<16x128xf32>
    %37 = arith.addf %35, %36 : vector<16x128xf32>
    %cst_21 = arith.constant 2.000000e-01 : f32
    %38 = vector.broadcast %cst_21 : f32 to vector<16x128xf32>
    %39 = arith.mulf %38, %37 : vector<16x128xf32>
    %40 = arith.maximumf %37, %39 : vector<16x128xf32>
    %c640 = arith.constant 640 : index
    %c0_22 = arith.constant 0 : index
    %41 = vector.load %arg1[%c640, %c0_22] : memref<896x128xf32, #tpu.memory_space<vmem>>, vector<128x128xf32>
    %c5 = arith.constant 5 : index
    %c0_23 = arith.constant 0 : index
    %42 = vector.load %arg2[%c5, %c0_23] : memref<8x128xf32, #tpu.memory_space<vmem>>, vector<1x128xf32>
    %cst_24 = arith.constant dense<0.000000e+00> : vector<16x128xf32>
    %43 = tpu.matmul %40, %41, %cst_24 {dimension_numbers = #tpu.dot_dimension_numbers<[1], [0], [0], [1], [0, 0, 1, 1], [], []>} : vector<16x128xf32>, vector<128x128xf32>, vector<16x128xf32> -> vector<16x128xf32>
    %44 = vector.broadcast %42 : vector<1x128xf32> to vector<16x128xf32>
    %45 = arith.addf %43, %44 : vector<16x128xf32>
    %cst_25 = arith.constant 2.000000e-01 : f32
    %46 = vector.broadcast %cst_25 : f32 to vector<16x128xf32>
    %47 = arith.mulf %46, %45 : vector<16x128xf32>
    %48 = arith.maximumf %45, %47 : vector<16x128xf32>
    %c768 = arith.constant 768 : index
    %c0_26 = arith.constant 0 : index
    %49 = vector.load %arg1[%c768, %c0_26] : memref<896x128xf32, #tpu.memory_space<vmem>>, vector<128x128xf32>
    %c6 = arith.constant 6 : index
    %c0_27 = arith.constant 0 : index
    %50 = vector.load %arg2[%c6, %c0_27] : memref<8x128xf32, #tpu.memory_space<vmem>>, vector<1x128xf32>
    %cst_28 = arith.constant dense<0.000000e+00> : vector<16x128xf32>
    %51 = tpu.matmul %48, %49, %cst_28 {dimension_numbers = #tpu.dot_dimension_numbers<[1], [0], [0], [1], [0, 0, 1, 1], [], []>} : vector<16x128xf32>, vector<128x128xf32>, vector<16x128xf32> -> vector<16x128xf32>
    %52 = vector.broadcast %50 : vector<1x128xf32> to vector<16x128xf32>
    %53 = arith.addf %51, %52 : vector<16x128xf32>
    %54 = math.tanh %53 : vector<16x128xf32>
    %c0_29 = arith.constant 0 : index
    %c0_30 = arith.constant 0 : index
    %55 = vector.load %arg3[%c0_29, %c0_30] : memref<16x128xf32, #tpu.memory_space<vmem>>, vector<16x128xf32>
    tpu.vector_store %arg3[%c0_29, %c0_30], %54 {strides = array<i32>} : memref<16x128xf32, #tpu.memory_space<vmem>>, vector<16x128xf32>,
    return
  }
}

</mosaic_0001>

<bundles_post_ra>
// kernel: encoder_forward.1
= control target key start
LH: loop header
LB: loop body
LE: loop exit
PB: predicated region body
PF: predicated region fallthrough
CT: control target
= control target key end

     0   :  { %8 = vsyncpa [#allocation3], 0  ;;  %s1487_s0 = inlined_call_operand.vmem [shape: f32[16,128], index: 0, kind: input, shape index: {}]   ;;  %s1488_s1 = inlined_call_operand.hbm [shape: f32[896,128], index: 1, kind: input, shape index: {}]   ;;  %s1489_s2 = inlined_call_operand.vmem [shape: f32[8,128], index: 2, kind: input, shape index: {}]   ;;  %s1490_s3 = inlined_call_operand.hbm [shape: f32[16,128], index: 3, kind: output, shape index: {}]  }
   0x1   :  { %9 = vsyncpa [#allocation4], 0  ;;  %s1406_s12 = smov [#allocation2]   ;;  %s1358_s16 = scalar_lea.hbm %s1488_s1, 14336 }
   0x2   :  { %s17_s13 = sshll.u32 %s1406_s12, 4  ;;  %p1359_p0 = scmp.ne.s32.totalorder %s1488_s1, %s1358_s16  ;;  %s18_s13 = int_to_ptr.vmem [resolvable:$true] %s17_s13 }
   0x3   :  { %p1362_p1 = scmp.lt.u32.totalorder %s1358_s16, %s1488_s1 }
   0x5   :  { %p1364_p2 = pnand %p1362_p1, %p1359_p0 }
   0x7   :  { %1367 = shalt.err (!%p1364_p2)
}
   0x8   :  { %s1368_s21 = scalar_lea.vmem %s18_s13, 14336  ;;  %p1373_p4 = scmp.lt.s32.totalorder %s18_s13, %s18_s13 }
   0x9   :  { %p1369_p3 = scmp.ne.s32.totalorder %s18_s13, %s1368_s21  ;;  %p1374_p5 = scmp.lt.s32.totalorder %s1368_s21, %s1368_s21 }
   0xb   :  { %p1375_p6 = por %p1374_p5, %p1373_p4 }
   0xd   :  { %p1376_p7 = pnand %p1375_p6, %p1369_p3 }
   0xf   :  { %1379 = shalt.err (!%p1376_p7)
}
  0x10   :  { %s1407_s22 = smov 128   ;;  %s1408_s23 = smov 8  }
  0x11   :  { %23 = dma.hbm_to_vmem [thread:$0]  %s1488_s1, 14336, %s18_s13, [#allocation3], %s1407_s22, %s1407_s22, %s1408_s23  }
  0x12   :  { %1402 = dma.done.wait [#allocation3], 14336  }
  0x13   :  { %1403 = vsyncadd [#allocation3], 4294952960  ;;  %v31_v0 = vld [vmem:[#allocation2] sm:$0xff]  ;;  %v32_v1 = vld [vmem:[#allocation2 + $0x8] sm:$0xff]  ;;  %s1409_s15 = smov [#allocation5]  }
  0x14   :  { %v33_v2 = vld [vmem:[#allocation2 + $0x10] sm:$0xff]  ;;  %v1126_v3 = vpack.c.bf16 %v32_v1, %v31_v0  ;;  %v34_v4 = vld [vmem:[#allocation2 + $0x18] sm:$0xff]  ;;  %v35_v6 = vld [vmem:[#allocation2 + $0x20] sm:$0xff]  ;;  %s736_s16 = sshll.u32 %s1409_s15, 4  ;;  %s737_s16 = int_to_ptr.vmem [resolvable:$true] %s736_s16 }
  0x15   :  { %v1130_v5 = vpack.c.bf16 %v34_v4, %v33_v2  ;;  %v36_v7 = vld [vmem:[#allocation2 + $0x28] sm:$0xff]  ;;  %v37_v9 = vld [vmem:[#allocation2 + $0x30] sm:$0xff]  ;;  %v38_v10 = vld [vmem:[#allocation2 + $0x38] sm:$0xff]  ;;  %s1380_s17 = scalar_lea.vmem %s737_s16, 256  ;;  %p1385_p9 = scmp.lt.s32.totalorder %s737_s16, %s737_s16 }
  0x16   :  { %1127 = vmatprep.subr.bf16.mxu0 %v1126_v3  ;;  %v1134_v8 = vpack.c.bf16 %v36_v7, %v35_v6  ;;  %v29_v11 = vld [vmem:[%s1487_s0] sm:$0xff]  ;;  %v132_v13 = vld [vmem:[#allocation2 + $0x88] sm:$0xff]  ;;  %v133_v14 = vld [vmem:[#allocation2 + $0x90] sm:$0xff]  ;;  %v1138_v20 = vpack.c.bf16 %v38_v10, %v37_v9  ;;  %p1381_p8 = scmp.ne.s32.totalorder %s737_s16, %s1380_s17  ;;  %p1386_p10 = scmp.lt.s32.totalorder %s1380_s17, %s1380_s17 }
  0x17   :  { %1129 = vmatpush3.bf16.msra.mxu0 %v1126_v3  ;;  %913 = vmatprep.mubr.f32.mxu0 %v29_v11  ;;  %v131_v12 = vld [vmem:[#allocation2 + $0x80] sm:$0xff]  ;;  %v134_v16 = vld [vmem:[#allocation2 + $0x98] sm:$0xff]  ;;  %v136_v19 = vld [vmem:[#allocation2 + $0xa8] sm:$0xff] }
  0x18   :  { %1131 = vmatprep.subr.bf16.mxu0 %v1130_v5  ;;  %v1158_v15 = vpack.c.bf16 %v132_v13, %v131_v12  ;;  %v1162_v17 = vpack.c.bf16 %v134_v16, %v133_v14  ;;  %v135_v18 = vld [vmem:[#allocation2 + $0xa0] sm:$0xff]  ;;  %v40_v22 = vld [vmem:[#allocation2 + $0x48] sm:$0xff]  ;;  %v137_v24 = vld [vmem:[#allocation2 + $0xb0] sm:$0xff]  ;;  %p1387_p11 = por %p1386_p10, %p1385_p9 }
  0x19   :  { %v39_v21 = vld [vmem:[#allocation2 + $0x40] sm:$0xff]  ;;  %v1166_v23 = vpack.c.bf16 %v136_v19, %v135_v18  ;;  %v138_v25 = vld [vmem:[#allocation2 + $0xb8] sm:$0xff]  ;;  %v41_v27 = vld [vmem:[#allocation2 + $0x50] sm:$0xff] }
  0x1a   :  { %1159 = vmatprep.subr.bf16.mxu1 %v1158_v15  ;;  %v1142_v26 = vpack.c.bf16 %v40_v22, %v39_v21  ;;  %v42_v28 = vld [vmem:[#allocation2 + $0x58] sm:$0xff]  ;;  %v1170_v29 = vpack.c.bf16 %v138_v25, %v137_v24  ;;  %v139_v30 = vld [vmem:[#allocation2 + $0xc0] sm:$0xff]  ;;  %v140_v31 = vld [vmem:[#allocation2 + $0xc8] sm:$0xff]  ;;  %p1388_p12 = pnand %p1387_p11, %p1381_p8 }
  0x1b   :  { %1133 = vmatpush3.bf16.msra.mxu0 %v1130_v5  ;;  %1161 = vmatpush3.bf16.msra.mxu1 %v1158_v15  ;;  %v1146_v32 = vpack.c.bf16 %v42_v28, %v41_v27  ;;  %v43_v33 = vld [vmem:[#allocation2 + $0x60] sm:$0xff]  ;;  %v44_v34 = vld [vmem:[#allocation2 + $0x68] sm:$0xff]  ;;  %v1174_v35 = vpack.c.bf16 %v140_v31, %v139_v30  ;;  %v141_v36 = vld [vmem:[#allocation2 + $0xd0] sm:$0xff] }
  0x1c   :  { %1135 = vmatprep.subr.bf16.mxu0 %v1134_v8  ;;  %1163 = vmatprep.subr.bf16.mxu1 %v1162_v17  ;;  %v142_v37 = vld [vmem:[#allocation2 + $0xd8] sm:$0xff]  ;;  %v1150_v38 = vpack.c.bf16 %v44_v34, %v43_v33  ;;  %v45_v39 = vld [vmem:[#allocation2 + $0x70] sm:$0xff]  ;;  %v30_v43 = vld [vmem:[%s1487_s0 + $0x8] sm:$0xff] }
  0x1d   :  { %v46_v40 = vld [vmem:[#allocation2 + $0x78] sm:$0xff]  ;;  %v1178_v41 = vpack.c.bf16 %v142_v37, %v141_v36  ;;  %v143_v44 = vld [vmem:[#allocation2 + $0xe0] sm:$0xff]  ;;  %v144_v45 = vld [vmem:[#allocation2 + $0xe8] sm:$0xff] }
  0x1e   :  { %v1154_v42 = vpack.c.bf16 %v46_v40, %v45_v39  ;;  %v1182_v46 = vpack.c.bf16 %v144_v45, %v143_v44  ;;  %v145_v47 = vld [vmem:[#allocation2 + $0xf0] sm:$0xff]  ;;  %v146_v48 = vld [vmem:[#allocation2 + $0xf8] sm:$0xff]  ;;  %v231_v50 = vld [vmem:[#allocation2 + $0x100] sm:$0xff] }
  0x1f   :  { %1137 = vmatpush3.bf16.msra.mxu0 %v1134_v8  ;;  %1165 = vmatpush3.bf16.msra.mxu1 %v1162_v17  ;;  %v1186_v49 = vpack.c.bf16 %v146_v48, %v145_v47  ;;  %v232_v51 = vld [vmem:[#allocation2 + $0x108] sm:$0xff]  ;;  %v233_v52 = vld [vmem:[#allocation2 + $0x110] sm:$0xff]  ;;  %v234_v54 = vld [vmem:[#allocation2 + $0x118] sm:$0xff] }
  0x20   :  { %1139 = vmatprep.subr.bf16.mxu0 %v1138_v20  ;;  %1167 = vmatprep.subr.bf16.mxu1 %v1166_v23  ;;  %v1190_v53 = vpack.c.bf16 %v232_v51, %v231_v50  ;;  %v1194_v55 = vpack.c.bf16 %v234_v54, %v233_v52  ;;  %v235_v56 = vld [vmem:[#allocation2 + $0x120] sm:$0xff]  ;;  %v236_v57 = vld [vmem:[#allocation2 + $0x128] sm:$0xff]  ;;  %v237_v59 = vld [vmem:[#allocation2 + $0x130] sm:$0xff] }
  0x21   :  { %v1198_v58 = vpack.c.bf16 %v236_v57, %v235_v56  ;;  %v238_v60 = vld [vmem:[#allocation2 + $0x138] sm:$0xff]  ;;  %v239_v62 = vld [vmem:[#allocation2 + $0x140] sm:$0xff]  ;;  %v240_v63 = vld [vmem:[#allocation2 + $0x148] sm:$0xff] }
  0x22   :  { %v1202_v61 = vpack.c.bf16 %v238_v60, %v237_v59  ;;  %v1206_v0 = vpack.c.bf16 %v240_v63, %v239_v62  ;;  %v241_v1 = vld [vmem:[#allocation2 + $0x150] sm:$0xff]  ;;  %v242_v2 = vld [vmem:[#allocation2 + $0x158] sm:$0xff]  ;;  %v748_v4 = vld [vmem:[%s1489_s2] ss:$0 sm:$0xff] }
  0x23   :  { %1141 = vmatpush3.bf16.msra.mxu0 %v1138_v20  ;;  %1169 = vmatpush3.bf16.msra.mxu1 %v1166_v23  ;;  %v1210_v3 = vpack.c.bf16 %v242_v2, %v241_v1  ;;  %v243_v13 = vld [vmem:[#allocation2 + $0x160] sm:$0xff]  ;;  %v244_v14 = vld [vmem:[#allocation2 + $0x168] sm:$0xff]  ;;  %v245_v16 = vld [vmem:[#allocation2 + $0x170] sm:$0xff] }
  0x24   :  { %1143 = vmatprep.subr.bf16.mxu0 %v1142_v26  ;;  %1171 = vmatprep.subr.bf16.mxu1 %v1170_v29  ;;  %v1214_v15 = vpack.c.bf16 %v244_v14, %v243_v13  ;;  %v246_v17 = vld [vmem:[#allocation2 + $0x178] sm:$0xff]  ;;  %v331_v19 = vld [vmem:[#allocation2 + $0x180] sm:$0xff]  ;;  %v332_v20 = vld [vmem:[#allocation2 + $0x188] sm:$0xff] }
  0x25   :  { %v1218_v18 = vpack.c.bf16 %v246_v17, %v245_v16  ;;  %v333_v21 = vld [vmem:[#allocation2 + $0x190] sm:$0xff]  ;;  %v1222_v22 = vpack.c.bf16 %v332_v20, %v331_v19  ;;  %v334_v23 = vld [vmem:[#allocation2 + $0x198] sm:$0xff]  ;;  %v335_v25 = vld [vmem:[#allocation2 + $0x1a0] sm:$0xff] }
  0x26   :  { %v1226_v24 = vpack.c.bf16 %v334_v23, %v333_v21  ;;  %v337_v28 = vld [vmem:[#allocation2 + $0x1b0] sm:$0xff]  ;;  %v339_v31 = vld [vmem:[#allocation2 + $0x1c0] sm:$0xff]  ;;  %v344_v47 = vld [vmem:[#allocation2 + $0x1e8] sm:$0xff] }
  0x27   :  { %1145 = vmatpush3.bf16.msra.mxu0 %v1142_v26  ;;  %1173 = vmatpush3.bf16.msra.mxu1 %v1170_v29  ;;  %v336_v26 = vld [vmem:[#allocation2 + $0x1a8] sm:$0xff]  ;;  %v338_v29 = vld [vmem:[#allocation2 + $0x1b8] sm:$0xff]  ;;  %v341_v34 = vld [vmem:[#allocation2 + $0x1d0] sm:$0xff] }
  0x28   :  { %1147 = vmatprep.subr.bf16.mxu0 %v1146_v32  ;;  %1175 = vmatprep.subr.bf16.mxu1 %v1174_v35  ;;  %v1230_v27 = vpack.c.bf16 %v336_v26, %v335_v25  ;;  %v1234_v30 = vpack.c.bf16 %v338_v29, %v337_v28  ;;  %v749_v37 = vld [vmem:[%s1489_s2 + $0x1] ss:$0 sm:$0xff]  ;;  %v346_v50 = vld [vmem:[#allocation2 + $0x1f8] sm:$0xff]  ;;  %v433_v54 = vld [vmem:[#allocation2 + $0x210] sm:$0xff] }
  0x29   :  { %v431_v52 = vld [vmem:[#allocation2 + $0x200] sm:$0xff]  ;;  %v434_v56 = vld [vmem:[#allocation2 + $0x218] sm:$0xff]  ;;  %v436_v59 = vld [vmem:[#allocation2 + $0x228] sm:$0xff] }
  0x2a   :  { %v1258_v57 = vpack.c.bf16 %v434_v56, %v433_v54  ;;  %v438_v62 = vld [vmem:[#allocation2 + $0x238] sm:$0xff]  ;;  %v440_v1 = vld [vmem:[#allocation2 + $0x248] sm:$0xff]  ;;  %v531_v21 = vld [vmem:[#allocation2 + $0x280] sm:$0xff] }
  0x2b   :  { %1149 = vmatpush3.bf16.msra.mxu0 %v1146_v32  ;;  %1177 = vmatpush3.bf16.msra.mxu1 %v1174_v35  ;;  %v340_v32 = vld [vmem:[#allocation2 + $0x1c8] sm:$0xff]  ;;  %v342_v35 = vld [vmem:[#allocation2 + $0x1d8] sm:$0xff]  ;;  %v533_v23 = vld [vmem:[#allocation2 + $0x290] sm:$0xff] }
  0x2c   :  { %1151 = vmatprep.subr.bf16.mxu0 %v1150_v38  ;;  %1179 = vmatprep.subr.bf16.mxu1 %v1178_v41  ;;  %v1238_v33 = vpack.c.bf16 %v340_v32, %v339_v31  ;;  %v1242_v36 = vpack.c.bf16 %v342_v35, %v341_v34  ;;  %v444_v16 = vld [vmem:[#allocation2 + $0x268] sm:$0xff]  ;;  %v446_v19 = vld [vmem:[#allocation2 + $0x278] sm:$0xff]  ;;  %v631_v54 = vld [vmem:[#allocation2 + $0x300] sm:$0xff] }
  0x2d   :  { %v534_v25 = vld [vmem:[#allocation2 + $0x298] sm:$0xff]  ;;  %v536_v28 = vld [vmem:[#allocation2 + $0x2a8] sm:$0xff]  ;;  %v633_v56 = vld [vmem:[#allocation2 + $0x310] sm:$0xff] }
  0x2e   :  { %v1290_v26 = vpack.c.bf16 %v534_v25, %v533_v23  ;;  %v538_v31 = vld [vmem:[#allocation2 + $0x2b8] sm:$0xff]  ;;  %v540_v34 = vld [vmem:[#allocation2 + $0x2c8] sm:$0xff]  ;;  %v753_v23 = vld [vmem:[%s1489_s2 + $0x5] ss:$0 sm:$0xff] }
  0x2f   :  { %1153 = vmatpush3.bf16.msra.mxu0 %v1150_v38  ;;  %1181 = vmatpush3.bf16.msra.mxu1 %v1178_v41 }
  0x30   :  { %1155 = vmatprep.subr.bf16.mxu0 %v1154_v42  ;;  %1183 = vmatprep.subr.bf16.mxu1 %v1182_v46 }
  0x33   :  { %1157 = vmatpush3.bf16.msra.mxu0 %v1154_v42  ;;  %1185 = vmatpush3.bf16.msra.mxu1 %v1182_v46  ;;  %v343_v46 = vld [vmem:[#allocation2 + $0x1e0] sm:$0xff] }
  0x34   :  { %1187 = vmatprep.subr.bf16.mxu1 %v1186_v49  ;;  %1191 = vmatprep.subr.bf16.mxu0 %v1190_v53  ;;  %v1246_v48 = vpack.c.bf16 %v344_v47, %v343_v46 }
  0x36   :  { %914 = vmatmul.mubr.f32.vlgmr.msra.gmra.mrb[0].mxu0 %v30_v43 }
  0x37   :  { %1189 = vmatpush3.bf16.msra.mxu1 %v1186_v49  ;;  %1193 = vmatpush3.bf16.msra.mxu0 %v1190_v53  ;;  %v345_v49 = vld [vmem:[#allocation2 + $0x1f0] sm:$0xff]  ;;  %v432_v53 = vld [vmem:[#allocation2 + $0x208] sm:$0xff] }
  0x38   :  { %1195 = vmatprep.subr.bf16.mxu0 %v1194_v55  ;;  %1223 = vmatprep.subr.bf16.mxu1 %v1222_v22  ;;  %v1250_v51 = vpack.c.bf16 %v346_v50, %v345_v49  ;;  %v544_v49 = vld [vmem:[#allocation2 + $0x2e8] sm:$0xff] }
  0x3b   :  { %1197 = vmatpush3.bf16.msra.mxu0 %v1194_v55  ;;  %v1254_v55 = vpack.c.bf16 %v432_v53, %v431_v52  ;;  %v546_v52 = vld [vmem:[#allocation2 + $0x2f8] sm:$0xff] }
  0x3c   :  { %1199 = vmatprep.subr.bf16.mxu0 %v1198_v58 }
  0x3f   :  { %1201 = vmatpush3.bf16.msra.mxu0 %v1198_v58  ;;  %v435_v58 = vld [vmem:[#allocation2 + $0x220] sm:$0xff] }
  0x40   :  { %1203 = vmatprep.subr.bf16.mxu0 %v1202_v61  ;;  %v1262_v60 = vpack.c.bf16 %v436_v59, %v435_v58  ;;  %v634_v58 = vld [vmem:[#allocation2 + $0x318] sm:$0xff] }
  0x41   :  { %v1322_v59 = vpack.c.bf16 %v634_v58, %v633_v56 }
  0x43   :  { %1205 = vmatpush3.bf16.msra.mxu0 %v1202_v61  ;;  %v437_v61 = vld [vmem:[#allocation2 + $0x230] sm:$0xff] }
  0x44   :  { %1207 = vmatprep.subr.bf16.mxu0 %v1206_v0  ;;  %v1266_v63 = vpack.c.bf16 %v438_v62, %v437_v61  ;;  %v636_v61 = vld [vmem:[#allocation2 + $0x328] sm:$0xff] }
  0x47   :  { %1209 = vmatpush3.bf16.msra.mxu0 %v1206_v0  ;;  %v439_v0 = vld [vmem:[#allocation2 + $0x240] sm:$0xff] }
  0x48   :  { %1211 = vmatprep.subr.bf16.mxu0 %v1210_v3  ;;  %v1270_v2 = vpack.c.bf16 %v440_v1, %v439_v0  ;;  %v638_v0 = vld [vmem:[#allocation2 + $0x338] sm:$0xff] }
  0x4b   :  { %1213 = vmatpush3.bf16.msra.mxu0 %v1210_v3  ;;  %v441_v3 = vld [vmem:[#allocation2 + $0x250] sm:$0xff] }
  0x4c   :  { %1215 = vmatprep.subr.bf16.mxu0 %v1214_v15 }
  0x4f   :  { %1217 = vmatpush3.bf16.msra.mxu0 %v1214_v15  ;;  %v443_v15 = vld [vmem:[#allocation2 + $0x260] sm:$0xff] }
  0x50   :  { %1219 = vmatprep.subr.bf16.mxu0 %v1218_v18  ;;  %v1278_v17 = vpack.c.bf16 %v444_v16, %v443_v15 }
  0x53   :  { %1221 = vmatpush3.bf16.msra.mxu0 %v1218_v18  ;;  %v445_v18 = vld [vmem:[#allocation2 + $0x270] sm:$0xff] }
  0x54   :  { %1255 = vmatprep.subr.bf16.mxu0 %v1254_v55  ;;  %v1282_v20 = vpack.c.bf16 %v446_v19, %v445_v18  ;;  %v644_v18 = vld [vmem:[#allocation2 + $0x368] sm:$0xff] }
 0x109   :  { %v915_v5 = vpop.f32.mrb[0].mxu0 }
 0x10a   :  { %v124_v6 = vadd.f32 %v915_v5, %v748_v4  ;;  %v118_v7 = vpop.f32.mrb[1].mxu0 }
 0x10b   :  { %v119_v8 = vadd.f32 %v748_v4, %v118_v7  ;;  %v442_v4 = vld [vmem:[#allocation2 + $0x258] sm:$0xff] }
 0x10c   :  { %v128_v9 = vmul.f32 0.2, %v124_v6  ;;  %v1274_v5 = vpack.c.bf16 %v442_v4, %v441_v3  ;;  %v640_v3 = vld [vmem:[#allocation2 + $0x348] sm:$0xff] }
 0x10d   :  { %v127_v10 = vmul.f32 0.2, %v119_v8 }
 0x10e   :  { %v130_v12 = vmax.f32 %v124_v6, %v128_v9  ;;  %v750_v6 = vld [vmem:[%s1489_s2 + $0x2] ss:$0 sm:$0xff] }
 0x10f   :  { %v129_v11 = vmax.f32 %v119_v8, %v127_v10 }
 0x111   :  { %948 = vmatprep.mubr.f32.mxu1 %v129_v11 }
 0x112   :  { %949 = vmatmul.mubr.f32.vlgmr.msra.gmra.mrb[0].mxu1 %v130_v12 }
 0x113   :  { %1225 = vmatpush3.bf16.msra.mxu1 %v1222_v22  ;;  %v532_v22 = vld [vmem:[#allocation2 + $0x288] sm:$0xff] }
 0x114   :  { %1227 = vmatprep.subr.bf16.mxu1 %v1226_v24 }
 0x117   :  { %1229 = vmatpush3.bf16.msra.mxu1 %v1226_v24  ;;  %v1286_v24 = vpack.c.bf16 %v532_v22, %v531_v21  ;;  %v646_v21 = vld [vmem:[#allocation2 + $0x378] sm:$0xff] }
 0x118   :  { %1231 = vmatprep.subr.bf16.mxu1 %v1230_v27 }
 0x11b   :  { %1233 = vmatpush3.bf16.msra.mxu1 %v1230_v27  ;;  %v535_v27 = vld [vmem:[#allocation2 + $0x2a0] sm:$0xff] }
 0x11c   :  { %1235 = vmatprep.subr.bf16.mxu1 %v1234_v30  ;;  %v1294_v29 = vpack.c.bf16 %v536_v28, %v535_v27 }
 0x11f   :  { %1237 = vmatpush3.bf16.msra.mxu1 %v1234_v30  ;;  %v537_v30 = vld [vmem:[#allocation2 + $0x2b0] sm:$0xff] }
 0x120   :  { %1239 = vmatprep.subr.bf16.mxu1 %v1238_v33  ;;  %v1298_v32 = vpack.c.bf16 %v538_v31, %v537_v30 }
 0x123   :  { %1241 = vmatpush3.bf16.msra.mxu1 %v1238_v33  ;;  %v539_v33 = vld [vmem:[#allocation2 + $0x2c0] sm:$0xff] }
 0x124   :  { %1243 = vmatprep.subr.bf16.mxu1 %v1242_v36  ;;  %v1302_v35 = vpack.c.bf16 %v540_v34, %v539_v33 }
 0x127   :  { %1245 = vmatpush3.bf16.msra.mxu1 %v1242_v36  ;;  %v541_v36 = vld [vmem:[#allocation2 + $0x2d0] sm:$0xff] }
 0x128   :  { %1247 = vmatprep.subr.bf16.mxu1 %v1246_v48 }
 0x12b   :  { %1249 = vmatpush3.bf16.msra.mxu1 %v1246_v48  ;;  %v543_v48 = vld [vmem:[#allocation2 + $0x2e0] sm:$0xff] }
 0x12c   :  { %1251 = vmatprep.subr.bf16.mxu1 %v1250_v51  ;;  %v1310_v50 = vpack.c.bf16 %v544_v49, %v543_v48 }
 0x12f   :  { %1253 = vmatpush3.bf16.msra.mxu1 %v1250_v51  ;;  %v545_v51 = vld [vmem:[#allocation2 + $0x2f0] sm:$0xff] }
 0x130   :  { %1287 = vmatprep.subr.bf16.mxu1 %v1286_v24  ;;  %v1314_v53 = vpack.c.bf16 %v546_v52, %v545_v51 }
 0x1e5   :  { %v950_v38 = vpop.f32.mrb[0].mxu1 }
 0x1e6   :  { %v224_v39 = vadd.f32 %v950_v38, %v749_v37  ;;  %v218_v40 = vpop.f32.mrb[1].mxu1 }
 0x1e7   :  { %v219_v41 = vadd.f32 %v749_v37, %v218_v40  ;;  %v542_v37 = vld [vmem:[#allocation2 + $0x2d8] sm:$0xff] }
 0x1e8   :  { %v228_v42 = vmul.f32 0.2, %v224_v39  ;;  %v1306_v38 = vpack.c.bf16 %v542_v37, %v541_v36 }
 0x1e9   :  { %v227_v43 = vmul.f32 0.2, %v219_v41 }
 0x1ea   :  { %v230_v45 = vmax.f32 %v224_v39, %v228_v42  ;;  %v751_v39 = vld [vmem:[%s1489_s2 + $0x3] ss:$0 sm:$0xff] }
 0x1eb   :  { %v229_v44 = vmax.f32 %v219_v41, %v227_v43 }
 0x1ed   :  { %983 = vmatprep.mubr.f32.mxu0 %v229_v44 }
 0x1ee   :  { %984 = vmatmul.mubr.f32.vlgmr.msra.gmra.mrb[2].mxu0 %v230_v45 }
 0x1ef   :  { %1257 = vmatpush3.bf16.msra.mxu0 %v1254_v55  ;;  %v632_v55 = vld [vmem:[#allocation2 + $0x308] sm:$0xff] }
 0x1f0   :  { %1259 = vmatprep.subr.bf16.mxu0 %v1258_v57 }
 0x1f3   :  { %1261 = vmatpush3.bf16.msra.mxu0 %v1258_v57  ;;  %v1318_v57 = vpack.c.bf16 %v632_v55, %v631_v54 }
 0x1f4   :  { %1263 = vmatprep.subr.bf16.mxu0 %v1262_v60 }
 0x1f7   :  { %1265 = vmatpush3.bf16.msra.mxu0 %v1262_v60  ;;  %v635_v60 = vld [vmem:[#allocation2 + $0x320] sm:$0xff] }
 0x1f8   :  { %1267 = vmatprep.subr.bf16.mxu0 %v1266_v63  ;;  %v1326_v62 = vpack.c.bf16 %v636_v61, %v635_v60 }
 0x1fb   :  { %1269 = vmatpush3.bf16.msra.mxu0 %v1266_v63  ;;  %v637_v63 = vld [vmem:[#allocation2 + $0x330] sm:$0xff] }
 0x1fc   :  { %1271 = vmatprep.subr.bf16.mxu0 %v1270_v2  ;;  %v1330_v1 = vpack.c.bf16 %v638_v0, %v637_v63 }
 0x1ff   :  { %1273 = vmatpush3.bf16.msra.mxu0 %v1270_v2  ;;  %v639_v2 = vld [vmem:[#allocation2 + $0x340] sm:$0xff] }
 0x200   :  { %1275 = vmatprep.subr.bf16.mxu0 %v1274_v5  ;;  %v1334_v4 = vpack.c.bf16 %v640_v3, %v639_v2 }
 0x203   :  { %1277 = vmatpush3.bf16.msra.mxu0 %v1274_v5  ;;  %v641_v5 = vld [vmem:[#allocation2 + $0x350] sm:$0xff] }
 0x204   :  { %1279 = vmatprep.subr.bf16.mxu0 %v1278_v17 }
 0x207   :  { %1281 = vmatpush3.bf16.msra.mxu0 %v1278_v17  ;;  %v643_v17 = vld [vmem:[#allocation2 + $0x360] sm:$0xff] }
 0x208   :  { %1283 = vmatprep.subr.bf16.mxu0 %v1282_v20  ;;  %v1342_v19 = vpack.c.bf16 %v644_v18, %v643_v17 }
 0x20b   :  { %1285 = vmatpush3.bf16.msra.mxu0 %v1282_v20  ;;  %v645_v20 = vld [vmem:[#allocation2 + $0x370] sm:$0xff] }
 0x20c   :  { %1319 = vmatprep.subr.bf16.mxu0 %v1318_v57  ;;  %v1346_v22 = vpack.c.bf16 %v646_v21, %v645_v20 }
 0x2c1   :  { %v985_v7 = vpop.f32.mrb[2].mxu0 }
 0x2c2   :  { %v324_v8 = vadd.f32 %v985_v7, %v750_v6  ;;  %v318_v9 = vpop.f32.mrb[3].mxu0 }
 0x2c3   :  { %v319_v10 = vadd.f32 %v750_v6, %v318_v9  ;;  %v642_v6 = vld [vmem:[#allocation2 + $0x358] sm:$0xff] }
 0x2c4   :  { %v328_v11 = vmul.f32 0.2, %v324_v8  ;;  %v1338_v7 = vpack.c.bf16 %v642_v6, %v641_v5 }
 0x2c5   :  { %v327_v12 = vmul.f32 0.2, %v319_v10 }
 0x2c6   :  { %v330_v14 = vmax.f32 %v324_v8, %v328_v11  ;;  %v752_v8 = vld [vmem:[%s1489_s2 + $0x4] ss:$0 sm:$0xff] }
 0x2c7   :  { %v329_v13 = vmax.f32 %v319_v10, %v327_v12 }
 0x2c9   :  { %1018 = vmatprep.mubr.f32.mxu1 %v329_v13 }
 0x2ca   :  { %1019 = vmatmul.mubr.f32.vlgmr.msra.gmra.mrb[2].mxu1 %v330_v14 }
 0x2cb   :  { %1289 = vmatpush3.bf16.msra.mxu1 %v1286_v24 }
 0x2cc   :  { %1291 = vmatprep.subr.bf16.mxu1 %v1290_v26 }
 0x2cf   :  { %1293 = vmatpush3.bf16.msra.mxu1 %v1290_v26 }
 0x2d0   :  { %1295 = vmatprep.subr.bf16.mxu1 %v1294_v29 }
 0x2d3   :  { %1297 = vmatpush3.bf16.msra.mxu1 %v1294_v29 }
 0x2d4   :  { %1299 = vmatprep.subr.bf16.mxu1 %v1298_v32 }
 0x2d7   :  { %1301 = vmatpush3.bf16.msra.mxu1 %v1298_v32  ;;  %v754_v32 = vld [vmem:[%s1489_s2 + $0x6] ss:$0 sm:$0xff] }
 0x2d8   :  { %1303 = vmatprep.subr.bf16.mxu1 %v1302_v35 }
 0x2db   :  { %1305 = vmatpush3.bf16.msra.mxu1 %v1302_v35 }
 0x2dc   :  { %1307 = vmatprep.subr.bf16.mxu1 %v1306_v38 }
 0x2df   :  { %1309 = vmatpush3.bf16.msra.mxu1 %v1306_v38 }
 0x2e0   :  { %1311 = vmatprep.subr.bf16.mxu1 %v1310_v50 }
 0x2e3   :  { %1313 = vmatpush3.bf16.msra.mxu1 %v1310_v50 }
 0x2e4   :  { %1315 = vmatprep.subr.bf16.mxu1 %v1314_v53 }
 0x2e7   :  { %1317 = vmatpush3.bf16.msra.mxu1 %v1314_v53 }
 0x39d   :  { %v1020_v40 = vpop.f32.mrb[2].mxu1 }
 0x39e   :  { %v424_v41 = vadd.f32 %v1020_v40, %v751_v39  ;;  %v418_v42 = vpop.f32.mrb[3].mxu1 }
 0x39f   :  { %v419_v43 = vadd.f32 %v751_v39, %v418_v42 }
 0x3a0   :  { %v428_v44 = vmul.f32 0.2, %v424_v41 }
 0x3a1   :  { %v427_v45 = vmul.f32 0.2, %v419_v43 }
 0x3a2   :  { %v430_v47 = vmax.f32 %v424_v41, %v428_v44 }
 0x3a3   :  { %v429_v46 = vmax.f32 %v419_v43, %v427_v45 }
 0x3a5   :  { %1053 = vmatprep.mubr.f32.mxu0 %v429_v46 }
 0x3a6   :  { %1054 = vmatmul.mubr.f32.vlgmr.msra.gmra.mrb[4].mxu0 %v430_v47 }
 0x3a7   :  { %1321 = vmatpush3.bf16.msra.mxu0 %v1318_v57 }
 0x3a8   :  { %1323 = vmatprep.subr.bf16.mxu0 %v1322_v59 }
 0x3ab   :  { %1325 = vmatpush3.bf16.msra.mxu0 %v1322_v59 }
 0x3ac   :  { %1327 = vmatprep.subr.bf16.mxu0 %v1326_v62 }
 0x3af   :  { %1329 = vmatpush3.bf16.msra.mxu0 %v1326_v62 }
 0x3b0   :  { %1331 = vmatprep.subr.bf16.mxu0 %v1330_v1 }
 0x3b3   :  { %1333 = vmatpush3.bf16.msra.mxu0 %v1330_v1 }
 0x3b4   :  { %1335 = vmatprep.subr.bf16.mxu0 %v1334_v4 }
 0x3b7   :  { %1337 = vmatpush3.bf16.msra.mxu0 %v1334_v4 }
 0x3b8   :  { %1339 = vmatprep.subr.bf16.mxu0 %v1338_v7 }
 0x3bb   :  { %1341 = vmatpush3.bf16.msra.mxu0 %v1338_v7 }
 0x3bc   :  { %1343 = vmatprep.subr.bf16.mxu0 %v1342_v19 }
 0x3bf   :  { %1345 = vmatpush3.bf16.msra.mxu0 %v1342_v19 }
 0x3c0   :  { %1347 = vmatprep.subr.bf16.mxu0 %v1346_v22 }
 0x3c3   :  { %1349 = vmatpush3.bf16.msra.mxu0 %v1346_v22 }
 0x479   :  { %v1055_v9 = vpop.f32.mrb[4].mxu0 }
 0x47a   :  { %v524_v10 = vadd.f32 %v1055_v9, %v752_v8  ;;  %v518_v11 = vpop.f32.mrb[5].mxu0 }
 0x47b   :  { %v519_v12 = vadd.f32 %v752_v8, %v518_v11 }
 0x47c   :  { %v528_v13 = vmul.f32 0.2, %v524_v10 }
 0x47d   :  { %v527_v14 = vmul.f32 0.2, %v519_v12 }
 0x47e   :  { %v530_v16 = vmax.f32 %v524_v10, %v528_v13 }
 0x47f   :  { %v529_v15 = vmax.f32 %v519_v12, %v527_v14 }
 0x481   :  { %1088 = vmatprep.mubr.f32.mxu1 %v529_v15 }
 0x482   :  { %1089 = vmatmul.mubr.f32.vlgmr.msra.gmra.mrb[4].mxu1 %v530_v16 }
 0x555   :  { %v1090_v24 = vpop.f32.mrb[4].mxu1 }
 0x556   :  { %v624_v25 = vadd.f32 %v1090_v24, %v753_v23  ;;  %v618_v26 = vpop.f32.mrb[5].mxu1 }
 0x557   :  { %v619_v27 = vadd.f32 %v753_v23, %v618_v26 }
 0x558   :  { %v628_v28 = vmul.f32 0.2, %v624_v25 }
 0x559   :  { %v627_v29 = vmul.f32 0.2, %v619_v27 }
 0x55a   :  { %v630_v31 = vmax.f32 %v624_v25, %v628_v28 }
 0x55b   :  { %v629_v30 = vmax.f32 %v619_v27, %v627_v29 }
 0x55d   :  { %1123 = vmatprep.mubr.f32.mxu0 %v629_v30 }
 0x55e   :  { %1124 = vmatmul.mubr.f32.vlgmr.msra.gmra.mrb[6].mxu0 %v630_v31 }
 0x631   :  { %v1125_v33 = vpop.f32.mrb[6].mxu0 }
 0x632   :  { %v724_v34 = vadd.f32 %v1125_v33, %v754_v32  ;;  %v718_v35 = vpop.f32.mrb[7].mxu0 }
 0x633   :  { %v719_v36 = vadd.f32 %v754_v32, %v718_v35 }
 0x634   :  { %1354 = vtanh.f32 %v724_v34 }
 0x635   :  { %1356 = vtanh.f32 %v719_v36 }
 0x63e   :  { %v1355_v37 = vpop.eup %1354 }
 0x63f   :  { %v1357_v38 = vpop.eup %1356  ;;  %730 = vst [vmem:[#allocation5 + $0x8] sm:$0xff] %v1355_v37 }
 0x640   :  { %729 = vst [vmem:[#allocation5] sm:$0xff] %v1357_v38 }
 0x641   :  { %1391 = shalt.err (!%p1388_p12)
}
 0x642   :  { %s1392_s19 = scalar_lea.hbm %s1490_s3, 256 }
 0x643   :  { %p1393_p13 = scmp.ne.s32.totalorder %s1490_s3, %s1392_s19  ;;  %p1396_p0 = scmp.lt.u32.totalorder %s1392_s19, %s1490_s3 }
 0x645   :  { %p1398_p1 = pnand %p1396_p0, %p1393_p13 }
 0x647   :  { %1401 = shalt.err (!%p1398_p1)
}
 0x648   :  { %742 = dma.vmem_to_hbm [thread:$0]  %s737_s16, 256, %s1490_s3, [#allocation4], %s1407_s22, %s1407_s22, %s1408_s23  }
 0x649   :  { %1404 = dma.done.wait [#allocation4], 256  }
 0x64a   :  { %1405 = vsyncadd [#allocation4], 4294967040 }
 0x64b   :  { %746 = vsyncpa [#allocation3], 1 }
 0x64c   :  { %747 = vsyncpa [#allocation4], 1 }

</bundles_post_ra>
